<compile_context>
chip_gen: v5e
topology: v5e:2x2
jax: 0.10.0
libtpu: 0.0.40
codegen_flags: <defaults>
</compile_context>

<pallas_src>
import functools

import jax
import jax.numpy as jnp
from jax.experimental import pallas as pl
from jax.experimental.pallas import tpu as pltpu

LN_EPS = 1e-5


def _embedding_kernel(flags_ref, tok_ref, emb_ref, invfreq_ref, phase_ref,
                      gamma_ref, beta_ref, out_ref, pos_ref, *,
                      padding_idx, vocab_size, hidden_dim, seq_len, tile_l,
                      batch_size):
    j = pl.program_id(0)        # sequence-tile index ("parallel")
    b = pl.program_id(1)        # batch index ("arbitrary", innermost)

    # ---- positional embedding: once per sequence tile, cached in scratch ----
    # Must NOT sit inside the padded-tile fast path: a later batch element of
    # the same tile may be non-padded and needs the cached value.
    @pl.when(b == 0)
    def _():
        row = jax.lax.broadcasted_iota(jnp.int32, (tile_l, 1), 0)       # (TL,1)
        position = (seq_len - 1.0) - (row + j * tile_l).astype(jnp.float32)
        # cos(x) == sin(x + pi/2); phase row = [0]*H/2 ++ [pi/2]*H/2, padded
        # columns have invfreq = 0 and phase = 0 -> sin(0) = 0.
        angle = position * invfreq_ref[...] + phase_ref[...]            # (TL,H)
        pos_ref[...] = jnp.sin(angle)

    flag = flags_ref[j * batch_size + b]

    @pl.when(flag == 0)
    def _():
        # Tile is entirely padding -> output is all zeros, skip the work.
        out_ref[...] = jnp.zeros_like(out_ref)

    @pl.when(flag != 0)
    def _():
        tok = tok_ref[0]                                          # (TL, 1) int32

        # --- token embedding gather as one-hot @ table (MXU, exact f32) -----
        one_hot = (tok == jax.lax.broadcasted_iota(
            jnp.int32, (tile_l, vocab_size), 1)).astype(jnp.float32)   # (TL, V)
        x = jnp.dot(one_hot, emb_ref[...],
                    preferred_element_type=jnp.float32)                # (TL, Hp)

        # --- add cached positional embedding ---------------------------------
        x = x + pos_ref[...]

        # --- LayerNorm over the true hidden width ----------------------------
        # Padded columns are exactly 0 (table + pos emb), so they contribute
        # nothing to the sums; divide by the true H.
        inv_h = 1.0 / hidden_dim
        s1 = jnp.sum(x, axis=-1, keepdims=True)
        s2 = jnp.sum(x * x, axis=-1, keepdims=True)
        mean = s1 * inv_h
        var = s2 * inv_h - mean * mean
        x = (x - mean) * jax.lax.rsqrt(var + LN_EPS)
        x = x * gamma_ref[...] + beta_ref[...]

        # --- zero out padding positions ---------------------------------------
        mask = (tok != padding_idx).astype(jnp.float32)            # (TL, 1)
        out_ref[0] = x * mask


def protein_resnet_embedding(tokens, emb_table, gamma, beta,
                             inverse_frequency, padding_idx):
    B, L = tokens.shape
    V, H = emb_table.shape
    assert H % 2 == 0 and inverse_frequency.shape[0] == H // 2, \
        "inverse_frequency must have length hidden_dim // 2"

    # --- lane-dense hidden width --------------------------------------------
    H_pad = ((H + 127) // 128) * 128

    # --- sequence tile selection ---------------------------------------------
    # Keep ~8 full-width (TL, H_pad) f32 buffers (double-buffered output +
    # Mosaic elementwise temps + pos scratch) under ~24 MiB so the same tile
    # is safe on v7x (64 MiB VMEM) as well as v5e/v6e (128 MiB).
    budget_bytes = 24 * 1024 * 1024
    tl_cap = max(128, (budget_bytes // (8 * H_pad * 4)) // 128 * 128)
    TL = min(1024, tl_cap)
    if L <= TL:
        TL = max(8, ((L + 7) // 8) * 8)
        # v7x has 2 TensorCores: give the "parallel" tile axis >= 2 points for
        # long single-sequence calls.
        if B == 1 and L >= 256:
            TL = max(128, ((TL // 2 + 127) // 128) * 128)

    num_tiles = pl.cdiv(L, TL)
    L_pad = num_tiles * TL

    tok = tokens.astype(jnp.int32)
    if L_pad != L:
        tok = jnp.pad(tok, ((0, 0), (0, L_pad - L)),
                      constant_values=padding_idx)

    # Per-(tile, batch) flag (flat 1-D -> no 2-D SMEM padding blowup).
    nonpad = (tok != padding_idx).reshape(B, num_tiles, TL).any(axis=-1)  # (B,nt)
    tile_flags = jnp.transpose(nonpad).reshape(-1).astype(jnp.int32)      # (nt*B,)

    tok3 = tok.reshape(B, L_pad, 1)

    def pad_cols(v):
        return jnp.pad(v, (0, H_pad - H)) if H_pad != H else v

    # Duplicate inverse_frequency to width H (sin half | cos half) and build
    # the phase row; pad both (and gamma/beta/table columns) to H_pad.
    invfreq_full = pad_cols(
        jnp.concatenate([inverse_frequency, inverse_frequency])
        .astype(jnp.float32)).reshape(1, H_pad)
    phase = pad_cols(
        jnp.concatenate([jnp.zeros((H // 2,), jnp.float32),
                         jnp.full((H // 2,), jnp.pi / 2, jnp.float32)])
    ).reshape(1, H_pad)
    gamma2 = pad_cols(gamma.astype(jnp.float32)).reshape(1, H_pad)
    beta2 = pad_cols(beta.astype(jnp.float32)).reshape(1, H_pad)
    emb = emb_table.astype(jnp.float32)
    if H_pad != H:
        emb = jnp.pad(emb, ((0, 0), (0, H_pad - H)))

    kernel = functools.partial(_embedding_kernel,
                               padding_idx=padding_idx, vocab_size=V,
                               hidden_dim=H, seq_len=L, tile_l=TL,
                               batch_size=B)

    grid_spec = pltpu.PrefetchScalarGridSpec(
        num_scalar_prefetch=1,
        grid=(num_tiles, B),
        in_specs=[
            pl.BlockSpec((1, TL, 1), lambda j, b, f: (b, j, 0)),      # tokens
            pl.BlockSpec((V, H_pad), lambda j, b, f: (0, 0)),         # emb table
            pl.BlockSpec((1, H_pad), lambda j, b, f: (0, 0)),         # inv freq
            pl.BlockSpec((1, H_pad), lambda j, b, f: (0, 0)),         # phase
            pl.BlockSpec((1, H_pad), lambda j, b, f: (0, 0)),         # gamma
            pl.BlockSpec((1, H_pad), lambda j, b, f: (0, 0)),         # beta
        ],
        out_specs=pl.BlockSpec((1, TL, H_pad), lambda j, b, f: (b, j, 0)),
        scratch_shapes=[pltpu.VMEM((TL, H_pad), jnp.float32)],        # pos emb
    )

    out = pl.pallas_call(
        kernel,
        out_shape=jax.ShapeDtypeStruct((B, L_pad, H_pad), jnp.float32),
        grid_spec=grid_spec,
        compiler_params=pltpu.CompilerParams(
            dimension_semantics=("parallel", "arbitrary"),
            vmem_limit_bytes=40 * 1024 * 1024),
    )(tile_flags, tok3, emb, invfreq_full, phase, gamma2, beta2)

    return out[:, :L, :H]


def _reference(tokens, emb_table, gamma, beta, inverse_frequency, padding_idx):
    B, L = tokens.shape
    x = emb_table[tokens]
    position_ids = jnp.arange(L - 1, -1, -1.0, dtype=jnp.float32)
    sinusoidal = position_ids[:, None] * inverse_frequency[None, :]
    pos_emb = jnp.concatenate([jnp.sin(sinusoidal), jnp.cos(sinusoidal)], -1)
    x = x + pos_emb[None]
    mean = x.mean(-1, keepdims=True)
    var = ((x - mean) ** 2).mean(-1, keepdims=True)
    x = (x - mean) / jnp.sqrt(var + LN_EPS) * gamma + beta
    mask = 1.0 - (tokens == padding_idx).astype(x.dtype)[..., None]
    return x * mask


if __name__ == "__main__":
    # Small deterministic setup: vocab=25 tokens, hidden=32, batch=2, seq=8.
    B, L, H, V = 2, 8, 32, 25
    padding_idx = 0

    key = jax.random.PRNGKey(0)
    k_tok, k_emb, k_g, k_b = jax.random.split(key, 4)

    tokens = jax.random.randint(k_tok, (B, L), 1, V, dtype=jnp.int32)
    tokens = tokens.at[0, -2:].set(padding_idx)   # give batch 0 some padding

    emb_table = 0.02 * jax.random.normal(k_emb, (V, H), dtype=jnp.float32)
    emb_table = emb_table.at[padding_idx].set(0.0)   # nn.Embedding padding_idx row
    gamma = 1.0 + 0.1 * jax.random.normal(k_g, (H,), dtype=jnp.float32)
    beta = 0.1 * jax.random.normal(k_b, (H,), dtype=jnp.float32)
    inverse_frequency = 1.0 / (10000.0 **
                               (jnp.arange(0.0, H, 2.0, dtype=jnp.float32) / H))

    out = protein_resnet_embedding(tokens, emb_table, gamma, beta,
                                   inverse_frequency, padding_idx)
    out = jax.block_until_ready(out)

    ref = _reference(tokens, emb_table, gamma, beta,
                     inverse_frequency, padding_idx)
    assert out.shape == (B, L, H)
    assert jnp.allclose(out, ref, atol=1e-4, rtol=1e-4), "mismatch vs reference"

    print("KERNEL_OK")
</pallas_src>

<mosaic_0001>
module attributes {stable_mosaic.version = 11 : i64} {
  func.func @_embedding_kernel(%arg0: i32, %arg1: i32, %arg2: memref<2xi32, #tpu.memory_space<smem>>, %arg3: memref<1x8x1xi32, #tpu.memory_space<vmem>>, %arg4: memref<25x128xf32, #tpu.memory_space<vmem>>, %arg5: memref<1x128xf32, #tpu.memory_space<vmem>>, %arg6: memref<1x128xf32, #tpu.memory_space<vmem>>, %arg7: memref<1x128xf32, #tpu.memory_space<vmem>>, %arg8: memref<1x128xf32, #tpu.memory_space<vmem>>, %arg9: memref<1x8x128xf32, #tpu.memory_space<vmem>>, %arg10: memref<8x128xf32, #tpu.memory_space<vmem>>) attributes {dimension_semantics = [#tpu.dimension_semantics<parallel>, #tpu.dimension_semantics<arbitrary>], iteration_bounds = array<i64: 1, 2>, scalar_prefetch = 1 : i64, scratch_operands = 1 : i64, tpu.core_type = #tpu.core_type<tc>, window_params = [{transform_indices = @transform_0, window_bounds = array<i64: 1, 8, 1>}, {pipeline_mode = #tpu.pipeline_mode<synchronous>, transform_indices = @transform_1, window_bounds = array<i64: 25, 128>}, {pipeline_mode = #tpu.pipeline_mode<synchronous>, transform_indices = @transform_2, window_bounds = array<i64: 1, 128>}, {pipeline_mode = #tpu.pipeline_mode<synchronous>, transform_indices = @transform_3, window_bounds = array<i64: 1, 128>}, {pipeline_mode = #tpu.pipeline_mode<synchronous>, transform_indices = @transform_4, window_bounds = array<i64: 1, 128>}, {pipeline_mode = #tpu.pipeline_mode<synchronous>, transform_indices = @transform_5, window_bounds = array<i64: 1, 128>}, {transform_indices = @transform_6, window_bounds = array<i64: 1, 8, 128>}]} {
    %c0_i32 = arith.constant 0 : i32
    %0 = arith.cmpi eq, %arg1, %c0_i32 : i32
    %1 = arith.extui %0 : i1 to i32
    %c0_i32_0 = arith.constant 0 : i32
    %2 = arith.cmpi ne, %1, %c0_i32_0 : i32
    scf.if %2 {
      %13 = tpu.iota {dimensions = array<i32: 0>} : vector<8x1xi32>
      %c8_i32 = arith.constant 8 : i32
      %14 = arith.muli %arg0, %c8_i32 : i32
      %15 = vector.broadcast %14 : i32 to vector<8x1xi32>
      %16 = arith.addi %13, %15 : vector<8x1xi32>
      %17 = arith.sitofp %16 : vector<8x1xi32> to vector<8x1xf32>
      %cst = arith.constant 7.000000e+00 : f32
      %18 = vector.broadcast %cst : f32 to vector<8x1xf32>
      %19 = arith.subf %18, %17 : vector<8x1xf32>
      %c0 = arith.constant 0 : index
      %c0_5 = arith.constant 0 : index
      %20 = vector.load %arg5[%c0, %c0_5] : memref<1x128xf32, #tpu.memory_space<vmem>>, vector<1x128xf32>
      %21 = vector.broadcast %19 : vector<8x1xf32> to vector<8x128xf32>
      %22 = vector.broadcast %20 : vector<1x128xf32> to vector<8x128xf32>
      %23 = arith.mulf %21, %22 : vector<8x128xf32>
      %c0_6 = arith.constant 0 : index
      %c0_7 = arith.constant 0 : index
      %24 = vector.load %arg6[%c0_6, %c0_7] : memref<1x128xf32, #tpu.memory_space<vmem>>, vector<1x128xf32>
      %25 = vector.broadcast %24 : vector<1x128xf32> to vector<8x128xf32>
      %26 = arith.addf %23, %25 : vector<8x128xf32>
      %27 = math.sin %26 : vector<8x128xf32>
      %c0_8 = arith.constant 0 : index
      %c0_9 = arith.constant 0 : index
      %28 = vector.load %arg10[%c0_8, %c0_9] : memref<8x128xf32, #tpu.memory_space<vmem>>, vector<8x128xf32>
      tpu.vector_store %arg10[%c0_8, %c0_9], %27 {strides = array<i32>} : memref<8x128xf32, #tpu.memory_space<vmem>>, vector<8x128xf32>,
    } else {
    }
    %c2_i32 = arith.constant 2 : i32
    %3 = arith.muli %arg0, %c2_i32 : i32
    %4 = arith.addi %3, %arg1 : i32
    %5 = arith.index_cast %4 : i32 to index
    %6 = memref.load %arg2[%5] : memref<2xi32, #tpu.memory_space<smem>>
    %c0_i32_1 = arith.constant 0 : i32
    %7 = arith.cmpi eq, %6, %c0_i32_1 : i32
    %8 = arith.extui %7 : i1 to i32
    %c0_i32_2 = arith.constant 0 : i32
    %9 = arith.cmpi ne, %8, %c0_i32_2 : i32
    scf.if %9 {
      %cst = arith.constant 0.000000e+00 : f32
      %13 = vector.broadcast %cst : f32 to vector<1x8x128xf32>
      %c0 = arith.constant 0 : index
      %c0_5 = arith.constant 0 : index
      %c0_6 = arith.constant 0 : index
      %14 = vector.load %arg9[%c0, %c0_5, %c0_6] : memref<1x8x128xf32, #tpu.memory_space<vmem>>, vector<1x8x128xf32>
      tpu.vector_store %arg9[%c0, %c0_5, %c0_6], %13 {strides = array<i32>} : memref<1x8x128xf32, #tpu.memory_space<vmem>>, vector<1x8x128xf32>,
    } else {
    }
    %c0_i32_3 = arith.constant 0 : i32
    %10 = arith.cmpi ne, %6, %c0_i32_3 : i32
    %11 = arith.extui %10 : i1 to i32
    %c0_i32_4 = arith.constant 0 : i32
    %12 = arith.cmpi ne, %11, %c0_i32_4 : i32
    scf.if %12 {
      %c0 = arith.constant 0 : index
      %c0_5 = arith.constant 0 : index
      %c0_6 = arith.constant 0 : index
      %13 = vector.load %arg3[%c0, %c0_5, %c0_6] : memref<1x8x1xi32, #tpu.memory_space<vmem>>, vector<1x8x1xi32>
      %14 = vector.shape_cast %13 : vector<1x8x1xi32> to vector<8x1xi32>
      %15 = tpu.iota {dimensions = array<i32: 1>} : vector<8x25xi32>
      %16 = vector.broadcast %14 : vector<8x1xi32> to vector<8x25xi32>
      %17 = arith.cmpi eq, %16, %15 : vector<8x25xi32>
      %18 = arith.extui %17 : vector<8x25xi1> to vector<8x25xi32>
      %19 = arith.sitofp %18 : vector<8x25xi32> to vector<8x25xf32>
      %c0_7 = arith.constant 0 : index
      %c0_8 = arith.constant 0 : index
      %20 = vector.load %arg4[%c0_7, %c0_8] : memref<25x128xf32, #tpu.memory_space<vmem>>, vector<25x128xf32>
      %cst = arith.constant dense<0.000000e+00> : vector<8x128xf32>
      %21 = tpu.matmul %19, %20, %cst {dimension_numbers = #tpu.dot_dimension_numbers<[1], [0], [0], [1], [0, 0, 1, 1], [], []>} : vector<8x25xf32>, vector<25x128xf32>, vector<8x128xf32> -> vector<8x128xf32>
      %c0_9 = arith.constant 0 : index
      %c0_10 = arith.constant 0 : index
      %22 = vector.load %arg10[%c0_9, %c0_10] : memref<8x128xf32, #tpu.memory_space<vmem>>, vector<8x128xf32>
      %23 = arith.addf %21, %22 : vector<8x128xf32>
      %cst_11 = arith.constant dense<0.000000e+00> : vector<8xf32>
      %24 = vector.multi_reduction <add>, %23, %cst_11 [1] : vector<8x128xf32> to vector<8xf32>
      %25 = vector.shape_cast %24 : vector<8xf32> to vector<8x1xf32>
      %26 = arith.mulf %23, %23 : vector<8x128xf32>
      %cst_12 = arith.constant dense<0.000000e+00> : vector<8xf32>
      %27 = vector.multi_reduction <add>, %26, %cst_12 [1] : vector<8x128xf32> to vector<8xf32>
      %28 = vector.shape_cast %27 : vector<8xf32> to vector<8x1xf32>
      %cst_13 = arith.constant 3.125000e-02 : f32
      %29 = vector.broadcast %cst_13 : f32 to vector<8x1xf32>
      %30 = arith.mulf %25, %29 : vector<8x1xf32>
      %cst_14 = arith.constant 3.125000e-02 : f32
      %31 = vector.broadcast %cst_14 : f32 to vector<8x1xf32>
      %32 = arith.mulf %28, %31 : vector<8x1xf32>
      %33 = arith.mulf %30, %30 : vector<8x1xf32>
      %34 = arith.subf %32, %33 : vector<8x1xf32>
      %35 = vector.broadcast %30 : vector<8x1xf32> to vector<8x128xf32>
      %36 = arith.subf %23, %35 : vector<8x128xf32>
      %cst_15 = arith.constant 9.99999974E-6 : f32
      %37 = vector.broadcast %cst_15 : f32 to vector<8x1xf32>
      %38 = arith.addf %34, %37 : vector<8x1xf32>
      %39 = math.rsqrt %38 : vector<8x1xf32>
      %40 = vector.broadcast %39 : vector<8x1xf32> to vector<8x128xf32>
      %41 = arith.mulf %36, %40 : vector<8x128xf32>
      %c0_16 = arith.constant 0 : index
      %c0_17 = arith.constant 0 : index
      %42 = vector.load %arg7[%c0_16, %c0_17] : memref<1x128xf32, #tpu.memory_space<vmem>>, vector<1x128xf32>
      %43 = vector.broadcast %42 : vector<1x128xf32> to vector<8x128xf32>
      %44 = arith.mulf %41, %43 : vector<8x128xf32>
      %c0_18 = arith.constant 0 : index
      %c0_19 = arith.constant 0 : index
      %45 = vector.load %arg8[%c0_18, %c0_19] : memref<1x128xf32, #tpu.memory_space<vmem>>, vector<1x128xf32>
      %46 = vector.broadcast %45 : vector<1x128xf32> to vector<8x128xf32>
      %47 = arith.addf %44, %46 : vector<8x128xf32>
      %c0_i32_20 = arith.constant 0 : i32
      %48 = vector.broadcast %c0_i32_20 : i32 to vector<8x1xi32>
      %49 = arith.cmpi ne, %14, %48 : vector<8x1xi32>
      %50 = arith.extui %49 : vector<8x1xi1> to vector<8x1xi32>
      %51 = arith.sitofp %50 : vector<8x1xi32> to vector<8x1xf32>
      %52 = vector.broadcast %51 : vector<8x1xf32> to vector<8x128xf32>
      %53 = arith.mulf %47, %52 : vector<8x128xf32>
      %c0_21 = arith.constant 0 : index
      %c0_22 = arith.constant 0 : index
      %c0_23 = arith.constant 0 : index
      %54 = vector.load %arg9[%c0_21, %c0_22, %c0_23] : memref<1x8x128xf32, #tpu.memory_space<vmem>>, vector<1x8x128xf32>
      %55 = vector.shape_cast %54 : vector<1x8x128xf32> to vector<8x128xf32>
      %56 = vector.shape_cast %53 : vector<8x128xf32> to vector<1x8x128xf32>
      tpu.vector_store %arg9[%c0_21, %c0_22, %c0_23], %56 {strides = array<i32>} : memref<1x8x128xf32, #tpu.memory_space<vmem>>, vector<1x8x128xf32>,
    } else {
    }
    return
  }
  func.func @transform_0(%arg0: i32, %arg1: i32, %arg2: memref<2xi32, #tpu.memory_space<smem>>) -> (i32, i32, i32) {
    %c0_i32 = arith.constant 0 : i32
    %c0_i32_0 = arith.constant 0 : i32
    return %arg1, %arg0, %c0_i32 : i32, i32, i32
  }
  func.func @transform_1(%arg0: i32, %arg1: i32, %arg2: memref<2xi32, #tpu.memory_space<smem>>) -> (i32, i32) {
    %c0_i32 = arith.constant 0 : i32
    %c0_i32_0 = arith.constant 0 : i32
    %c0_i32_1 = arith.constant 0 : i32
    return %c0_i32, %c0_i32_0 : i32, i32
  }
  func.func @transform_2(%arg0: i32, %arg1: i32, %arg2: memref<2xi32, #tpu.memory_space<smem>>) -> (i32, i32) {
    %c0_i32 = arith.constant 0 : i32
    %c0_i32_0 = arith.constant 0 : i32
    %c0_i32_1 = arith.constant 0 : i32
    return %c0_i32, %c0_i32_0 : i32, i32
  }
  func.func @transform_3(%arg0: i32, %arg1: i32, %arg2: memref<2xi32, #tpu.memory_space<smem>>) -> (i32, i32) {
    %c0_i32 = arith.constant 0 : i32
    %c0_i32_0 = arith.constant 0 : i32
    %c0_i32_1 = arith.constant 0 : i32
    return %c0_i32, %c0_i32_0 : i32, i32
  }
  func.func @transform_4(%arg0: i32, %arg1: i32, %arg2: memref<2xi32, #tpu.memory_space<smem>>) -> (i32, i32) {
    %c0_i32 = arith.constant 0 : i32
    %c0_i32_0 = arith.constant 0 : i32
    %c0_i32_1 = arith.constant 0 : i32
    return %c0_i32, %c0_i32_0 : i32, i32
  }
  func.func @transform_5(%arg0: i32, %arg1: i32, %arg2: memref<2xi32, #tpu.memory_space<smem>>) -> (i32, i32) {
    %c0_i32 = arith.constant 0 : i32
    %c0_i32_0 = arith.constant 0 : i32
    %c0_i32_1 = arith.constant 0 : i32
    return %c0_i32, %c0_i32_0 : i32, i32
  }
  func.func @transform_6(%arg0: i32, %arg1: i32, %arg2: memref<2xi32, #tpu.memory_space<smem>>) -> (i32, i32, i32) {
    %c0_i32 = arith.constant 0 : i32
    %c0_i32_0 = arith.constant 0 : i32
    return %arg1, %arg0, %c0_i32 : i32, i32, i32
  }
}

</mosaic_0001>

<bundles_post_ra>
// kernel: tpu_custom_call.1
= control target key start
LH: loop header
LB: loop body
LE: loop exit
PB: predicated region body
PF: predicated region fallthrough
CT: control target
= control target key end

     0   :  { %s909_s27 = smov [#allocation4]   ;;  %s1138_s0 = inlined_call_operand.vmem [shape: s32[2], index: 0, kind: input, shape index: {}]   ;;  %s1139_s1 = inlined_call_operand.vmem [shape: s32[2,8,1], index: 1, kind: input, shape index: {}]   ;;  %s1140_s2 = inlined_call_operand.hbm [shape: f32[25,128], index: 2, kind: input, shape index: {}]   ;;  %s1141_s3 = inlined_call_operand.vmem [shape: f32[1,128], index: 3, kind: input, shape index: {}]   ;;  %s1142_s4 = inlined_call_operand.vmem [shape: f32[1,128], index: 4, kind: input, shape index: {}]   ;;  %s1143_s5 = inlined_call_operand.vmem [shape: f32[1,128], index: 5, kind: input, shape index: {}]   ;;  %s1144_s6 = inlined_call_operand.vmem [shape: f32[1,128], index: 6, kind: input, shape index: {}]   ;;  %s1145_s7 = inlined_call_operand.hbm [shape: f32[2,8,128], index: 7, kind: output, shape index: {}]  }
   0x1   :  { %s13_s26 = sshll.u32 %s1138_s0, 4  ;;  %s14_s26 = int_to_ptr.vmem [resolvable:$true] %s13_s26 }
   0x2   :  { %16 = dma.vmem_to_smem %s14_s26, 16, %s909_s27, [#allocation3] }
   0x3   :  { %875 = dma.done.wait [#allocation3], 16 }
   0x4   :  { %876 = vsyncadd [#allocation3], 4294967280 }
   0x5   :  { %19 = sfence }
   0x6   :  { %20 = vsyncpa [#allocation6], 0 }
   0x7   :  { %21 = vsyncpa [#allocation7], 0 }
   0x8   :  { %23 = vsyncpa [#allocation7 + $0x1], 0  ;;  %s966_s28 = smov 0   ;;  %s968_s29 = smov 0  }
   0x9   :  { %s970_s30 = smov 0   ;;  %s972_s8 = smov 0  }
   0xa   :  { %s974_s9 = smov 0   ;;  %s976_s0 = smov 0  }
   0xb LB: > { %s671_s10 = sadd.s32 4294967295, %s907_s0   ;;  %s672_s11 = sadd.s32 4294967294, %s907_s0   ;;  %s907_s0 = sphi %s976_s0, %s29_s0   ;;  %s903_s9 = sphi %s974_s9, %s1152_s9   ;;  %s899_s8 = sphi %s972_s8, %s1151_s8   ;;  %s895_s30 = sphi %s970_s30, %s1150_s30   ;;  %s891_s29 = sphi %s968_s29, %s1149_s29   ;;  %s887_s28 = sphi %s966_s28, %s1148_s28  }
   0xc   : > { %s38_s12 = sadd.s32 1, %s903_s9  ;;  %s183_s13 = sadd.s32 1, %s895_s30 }
   0xd   : > { %p39_p0 = scmp.ge.s32.totalorder %s38_s12, 2  ;;  %p193_p1 = scmp.ne.s32.totalorder %s895_s30, %s891_s29 }
   0xe   : > { %p194_p2 = scmp.eq.s32.totalorder %s671_s10, 1  ;;  %p199_p3 = scmp.ne.s32.totalorder %s891_s29, %s887_s28 }
   0xf   : > { %s1154_s12 = smov (%p39_p0, %s38_s12), 0  ;;  %p200_p5 = scmp.eq.s32.totalorder %s672_s11, 1 }
  0x10   : > { %p1006_p4 = por %p194_p2, %p193_p1  ;;  %s178_s15 = ssub.s32 %s903_s9, %s1154_s12 }
  0x11   : > { %p673_p6 = scmp.ge.s32.totalorder %s907_s0, 1  ;;  %p181_p7 = scmp.eq.s32.totalorder %s178_s15, 0 }
  0x12   : > { %p1013_p8 = por %p200_p5, %p199_p3  ;;  %p207_p9 = scmp.lt.s32.totalorder %s907_s0, 3 }
  0x13   : > { %s1019_s17 = scalar_select %p181_p7, %s895_s30, %s183_s13  }
  0x14   : > { %p208_p10 = pnand %p673_p6, %p207_p9  ;;  %p708_p11 = scmp.eq.s32.totalorder %s671_s10, 0 }
  0x15   : > { %s218_s20 = sshll.u32 %s1140_s2, 4  ;;  %s910_s21 = smov [#allocation5]   ;;  %s219_s20 = int_to_ptr.hbm [resolvable:$true] %s218_s20 }
  0x16   : > { %p700_p12 = pneg %p208_p10  ;;  %s220_s22 = sshll.u32 %s910_s21, 4  ;;  %s221_s22 = int_to_ptr.vmem [resolvable:$true] %s220_s22 }
  0x17   : > { %s911_s23 = smov 128   ;;  %s912_s24 = smov 8  }
  0x18   : > { %p701_p13 = pnand %p708_p11, %p700_p12  ;;  %258 = sbr.rel (%p208_p10) target bundleno = 582 (0x246), region = 44 }
  0x1a   : > { %703 = dma.hbm_to_vmem [thread:$0]  (!%p701_p13), %s219_s20, 512, %s221_s22, [#allocation6], %s911_s23, %s911_s23, %s912_s24  }
  0x1d   : > { %878 = dma.done.wait (%p708_p11), [#allocation6], 512  }
  0x1e   : > { %880 = vsyncadd (%p708_p11), [#allocation6], 4294966784  ;;  %s288_s25 = sand.u32 1, %s891_s29   ;;  %p291_p0 = scmp.lt.s32.totalorder %s899_s8, 1 }
  0x1f   : > { %s678_s26 = sshll.u32 %s288_s25, 3  ;;  %p680_p1 = scmp.ne.s32.totalorder %s899_s8, 0 }
  0x20   : > { %s292_s27 = scalar_select %p291_p0, %s899_s8, 1 }
  0x21   : > { %s1034_s18 = scalar_lea.vmem [#allocation8], %s678_s26  ;;  %301 = sbr.rel (%p680_p1) target bundleno = 147 (0x93), region = 52 }
  0x22   : > { %s679_s10 = sshll.u32 %s292_s27, 3 }
  0x23   : > { %s1032_s15 = scalar_lea.vmem %s1139_s1, %s679_s10 }
  0x26   : > { %v302_v0 = vlaneseq  ;;  %v773_v3 = vld [vmem:[%s1141_s3] ss:$0 sm:$0xff]  ;;  %v913_v19 = vmov 683565275   ;;  %v914_v21 = vmov 2475754826  }
  0x27   : > { %v774_v5 = vld [vmem:[%s1142_s4] ss:$0 sm:$0xff]  ;;  %v915_v23 = vmov 2131351028   ;;  %v916_v25 = vmov 2102212464  }
  0x28   : > { %v303_v1 = vshrl.u32 %v302_v0, 7  ;;  %v917_v27 = vmov 920167782   ;;  %v918_v33 = vmov 1326507024  }
  0x2a   : > { %v307_v2 = vcvt.s32.f32 %v303_v1 }
  0x2c   : > { %v308_v4 = vsub.f32 7.0, %v307_v2 }
  0x2e   : > { %v313_v6 = vmul.f32 %v773_v3, %v308_v4 }
  0x30   : > { %v1043_v7 = vadd.f32 %v774_v5, %v313_v6 }
  0x32   : > { %v322_v8 = vand.u32 2139095040, %v1043_v7  ;;  %v319_v10 = vand.u32 2147483647, %v1043_v7  ;;  %vm321_vm12 = vcmp.lt.s32.totalorder %v1043_v7, 0 }
  0x34   : > { %v323_v9 = vshrl.u32 %v322_v8, 23  ;;  %v326_v13 = vand.u32 8388607, %v319_v10  ;;  %v919_v8 = vmov 0   ;;  %vm320_vm13 = vcmp.le.f32.partialorder %v319_v10, 0.7853982 }
  0x36   : > { %v681_v11 = vadd.s32 4294967169, %v323_v9  ;;  %v327_v16 = vor.u32 8388608, %v326_v13 }
  0x38   : > { %v329_v12 = vadd.s32 1, %v681_v11  ;;  %v1052_v35 = vshll.u32 %v327_v16, 8 }
  0x3a   : > { %vm330_vm0 = vcmp.gt.s32.totalorder %v329_v12, 0  ;;  %v368_v47 = vand.u32 65535, %v1052_v35  ;;  %v369_v48 = vshrl.u32 %v1052_v35, 16 }
  0x3b   : > { %v331_v14 = vsel %vm330_vm0, %v329_v12, 0 }
  0x3c   : > { %v333_v15 = vand.u32 31, %v331_v14  ;;  %v1049_v17 = vshrl.u32 %v331_v14, 5 }
  0x3e   : > { %v334_v18 = vsub.s32 32, %v333_v15  ;;  %v336_v20 = vshll.u32 %v913_v19, %v333_v15  ;;  %v339_v22 = vshll.u32 %v914_v21, %v333_v15  ;;  %v342_v24 = vshll.u32 %v915_v23, %v333_v15 }
  0x3f   : > { %v345_v26 = vshll.u32 %v916_v25, %v333_v15  ;;  %v348_v28 = vshll.u32 %v917_v27, %v333_v15  ;;  %vm351_vm1 = vcmp.lt.s32.totalorder %v1049_v17, 1  ;;  %vm354_vm2 = vcmp.lt.s32.totalorder %v1049_v17, 4 }
  0x40   : > { %v337_v29 = vshrl.u32 %v914_v21, %v334_v18  ;;  %v340_v30 = vshrl.u32 %v915_v23, %v334_v18  ;;  %v343_v31 = vshrl.u32 %v916_v25, %v334_v18  ;;  %v346_v32 = vshrl.u32 %v917_v27, %v334_v18 }
  0x41   : > { %v349_v34 = vshrl.u32 %v918_v33, %v334_v18  ;;  %vm353_vm3 = vcmp.lt.s32.totalorder %v1049_v17, 3  ;;  %vm352_vm4 = vcmp.lt.s32.totalorder %v1049_v17, 2  ;;  %v335_v55 = vshrl.u32 %v913_v19, %v334_v18 }
  0x42   : > { %v338_v36 = vor.u32 %v337_v29, %v336_v20  ;;  %v341_v37 = vor.u32 %v340_v30, %v339_v22  ;;  %v344_v38 = vor.u32 %v343_v31, %v342_v24  ;;  %v347_v39 = vor.u32 %v346_v32, %v345_v26 }
  0x43   : > { %v350_v40 = vor.u32 %v349_v34, %v348_v28 }
  0x44   : > { %v359_v41 = vsel %vm351_vm1, %v338_v36, %v341_v37  ;;  %v363_v42 = vsel %vm351_vm1, %v341_v37, %v344_v38  ;;  %v360_v43 = vsel %vm354_vm2, %v347_v39, 920167782  ;;  %v355_v4 = vsel %vm351_vm1, %v335_v55, %v338_v36 }
  0x45   : > { %v364_v44 = vsel %vm354_vm2, %v350_v40, 1326507024  ;;  %v361_v45 = vsel %vm353_vm3, %v344_v38, %v360_v43  ;;  %v356_v6 = vsel %vm354_vm2, %v344_v38, 2102212464  ;;  %vm462_vm1 = vweird.f32 %v1043_v7 }
  0x46   : > { %v365_v46 = vsel %vm353_vm3, %v347_v39, %v364_v44  ;;  %v362_v49 = vsel %vm352_vm4, %v359_v41, %v361_v45  ;;  %v357_v19 = vsel %vm353_vm3, %v341_v37, %v356_v6 }
  0x47   : > { %v366_v50 = vsel %vm352_vm4, %v363_v42, %v365_v46  ;;  %v392_v53 = vand.u32 65535, %v362_v49  ;;  %v393_v54 = vshrl.u32 %v362_v49, 16  ;;  %v358_v27 = vsel %vm352_vm4, %v355_v4, %v357_v19 }
  0x48   : > { %v370_v51 = vand.u32 65535, %v366_v50  ;;  %v371_v52 = vshrl.u32 %v366_v50, 16  ;;  %v412_v31 = vmul.u32 %v1052_v35, %v358_v27 }
  0x49   : > { %v394_v59 = vmul.u32 %v392_v53, %v368_v47  ;;  %v395_v60 = vmul.u32 %v393_v54, %v368_v47  ;;  %v396_v61 = vmul.u32 %v392_v53, %v369_v48  ;;  %v397_v1 = vmul.u32 %v393_v54, %v369_v48 }
  0x4a   : > { %v372_v56 = vmul.u32 %v370_v51, %v368_v47  ;;  %v373_v57 = vmul.u32 %v371_v52, %v368_v47  ;;  %v374_v58 = vmul.u32 %v370_v51, %v369_v48  ;;  %v375_v62 = vmul.u32 %v371_v52, %v369_v48 }
  0x4b   : > { %v398_v2 = vshll.u32 %v395_v60, 16  ;;  %v400_v3 = vshll.u32 %v396_v61, 16  ;;  %v399_v16 = vshrl.u32 %v395_v60, 16  ;;  %v401_v23 = vshrl.u32 %v396_v61, 16 }
  0x4c   : > { %v376_v63 = vshll.u32 %v373_v57, 16  ;;  %v378_v0 = vshll.u32 %v374_v58, 16  ;;  %v377_v12 = vshrl.u32 %v373_v57, 16  ;;  %v379_v20 = vshrl.u32 %v374_v58, 16 }
  0x4d   : > { %vm402_vm6 = vc.u32 %v394_v59, %v398_v2  ;;  %v404_v11 = vadd.s32 %v398_v2, %v394_v59 }
  0x4e   : > { %vm380_vm5 = vc.u32 %v372_v56, %v376_v63  ;;  %v382_v5 = vadd.s32 %v376_v63, %v372_v56  ;;  %v403_v14 = vsel %vm402_vm6, 1, %v919_v8 }
  0x4f   : > { %v381_v9 = vsel %vm380_vm5, 1, %v919_v8  ;;  %v405_v18 = vadd.s32 %v403_v14, %v397_v1  ;;  %vm406_vm8 = vc.u32 %v404_v11, %v400_v3  ;;  %v408_v26 = vadd.s32 %v404_v11, %v400_v3 }
  0x50   : > { %v383_v13 = vadd.s32 %v381_v9, %v375_v62  ;;  %vm384_vm7 = vc.u32 %v382_v5, %v378_v0  ;;  %v407_v22 = vsel %vm406_vm8, 1, %v919_v8 }
  0x51   : > { %v385_v15 = vsel %vm384_vm7, 1, %v919_v8  ;;  %v409_v24 = vadd.s32 %v407_v22, %v405_v18 }
  0x52   : > { %v387_v21 = vadd.s32 %v385_v15, %v383_v13 }
  0x53   : > { %v410_v28 = vadd.s32 %v409_v24, %v399_v16 }
  0x54   : > { %v388_v25 = vadd.s32 %v387_v21, %v377_v12 }
  0x55   : > { %v411_v30 = vadd.s32 %v410_v28, %v401_v23 }
  0x56   : > { %v389_v29 = vadd.s32 %v388_v25, %v379_v20 }
  0x57   : > { %v415_v32 = vadd.s32 1, %v411_v30 }
  0x58   : > { %vm414_vm9 = vc.u32 %v389_v29, %v408_v26  ;;  %v413_v17 = vadd.s32 %v408_v26, %v389_v29 }
  0x59   : > { %v416_v33 = vsel %vm414_vm9, %v415_v32, %v411_v30 }
  0x5a   : > { %v417_v34 = vadd.s32 %v416_v33, %v412_v31 }
  0x5c   : > { %v418_v36 = vadd.s32 536870912, %v417_v34 }
  0x5e   : > { %v419_v37 = vshrl.u32 %v418_v36, 30 }
  0x60   : > { %v420_v38 = vshll.u32 %v419_v37, 30  ;;  %v443_v55 = vsub.s32 4, %v419_v37 }
  0x62   : > { %v421_v39 = vsub.s32 %v417_v34, %v420_v38  ;;  %v444_v58 = vsel %vm321_vm12, %v443_v55, %v419_v37 }
  0x63   : > { %v446_v61 = vsel %vm320_vm13, 0, %v444_v58 }
  0x64   : > { %vm422_vm10 = vcmp.lt.s32.totalorder %v421_v39, 0  ;;  %v423_v40 = vsub.s32 0, %v421_v39  ;;  %v463_v2 = vadd.s32 3, %v446_v61 }
  0x66   : > { %v424_v41 = vsel %vm422_vm10, %v423_v40, %v421_v39  ;;  %v464_v8 = vand.u32 3, %v463_v2 }
  0x67   : > { %v425_v42 = vclz %v424_v41 }
  0x68   : > { %vm469_vm14 = vcmp.eq.s32.totalorder %v464_v8, 2  ;;  %vm466_vm15 = vcmp.eq.s32.totalorder %v464_v8, 0  ;;  %vm465_vm0 = vcmp.lt.s32.totalorder %v464_v8, 2 }
  0x69   : > { %v682_v43 = vadd.s32 4294967294, %v425_v42 }
  0x6b   : > { %vm683_vm11 = vcmp.lt.s32.totalorder %v682_v43, 0 }
  0x6c   : > { %v428_v44 = vsel %vm683_vm11, 0, %v682_v43 }
  0x6d   : > { %v429_v45 = vsub.s32 32, %v428_v44  ;;  %v430_v46 = vshll.u32 %v421_v39, %v428_v44  ;;  %v433_v47 = vsub.s32 4294967266, %v428_v44 }
  0x6f   : > { %v431_v35 = vshrl.u32 %v413_v17, %v429_v45  ;;  %v434_v48 = vadd.s32 127, %v433_v47 }
  0x71   : > { %v432_v49 = vor.u32 %v431_v35, %v430_v46  ;;  %v435_v50 = vshll.u32 %v434_v48, 23 }
  0x73   : > { %v436_v51 = vor.u32 4788187, %v435_v50  ;;  %v439_v52 = vcvt.s32.f32 %v432_v49 }
  0x75   : > { %v437_v53 = vand.u32 2147483647, %v436_v51 }
  0x77   : > { %v440_v54 = vmul.f32 %v439_v52, %v437_v53 }
  0x79   : > { %v441_v56 = vxor.u32 2147483648, %v440_v54 }
  0x7b   : > { %v442_v57 = vsel %vm321_vm12, %v441_v56, %v440_v54 }
  0x7c   : > { %v445_v59 = vsel %vm320_vm13, %v1043_v7, %v442_v57 }
  0x7d   : > { %v447_v60 = vmul.f32 %v445_v59, %v445_v59 }
  0x7f   : > { %v448_v62 = vmul.f32 -0.001358992, %v447_v60  ;;  %v455_v63 = vmul.f32 -0.00019511016, %v447_v60 }
  0x81   : > { %v449_v0 = vadd.f32 0.041655596, %v448_v62  ;;  %v456_v1 = vadd.f32 0.008332121, %v455_v63 }
  0x83   : > { %v450_v3 = vmul.f32 %v449_v0, %v447_v60  ;;  %v457_v4 = vmul.f32 %v456_v1, %v447_v60 }
  0x85   : > { %v451_v5 = vadd.f32 -0.4999988, %v450_v3  ;;  %v458_v6 = vadd.f32 -0.16666654, %v457_v4 }
  0x87   : > { %v452_v9 = vmul.f32 %v451_v5, %v447_v60  ;;  %v459_v11 = vmul.f32 %v458_v6, %v447_v60 }
  0x89   : > { %v453_v10 = vadd.f32 1.0, %v452_v9  ;;  %v460_v12 = vadd.f32 1.0, %v459_v11 }
  0x8b   : > { %v461_v13 = vmul.f32 %v460_v12, %v445_v59  ;;  %v470_v14 = vxor.u32 2147483648, %v453_v10 }
  0x8d   : > { %v467_v15 = vxor.u32 2147483648, %v461_v13  ;;  %v471_v16 = vsel %vm469_vm14, %v470_v14, %v461_v13 }
  0x8f   : > { %v468_v18 = vsel %vm466_vm15, %v453_v10, %v467_v15 }
  0x90   : > { %v472_v19 = vsel %vm465_vm0, %v468_v18, %v471_v16 }
  0x91   : > { %v473_v20 = vsel %vm462_vm1, nan, %v472_v19 }
  0x92   : > { %474 = vst [vmem:[#allocation2] sm:$0xff] %v473_v20 }
  0x93 PF: > { %s477_s23 = sld [smem:[#allocation4 + %s899_s8]] }
  0x99   : > { %p684_p2 = scmp.ne.s32.totalorder %s477_s23, 0 }
  0x9b   : > { %481 = sbr.rel (%p684_p2) target bundleno = 162 (0xa2), region = 56 }
  0xa0   : > { %v920_v21 = vmov 0.0  }
  0xa1   : > { %482 = vst [vmem:[%s1034_s18] sm:$0xff] %v920_v21 }
  0xa2 PF: > { %p685_p3 = scmp.eq.s32.totalorder %s477_s23, 0 }
  0xa4   : > { %486 = sbr.rel (%p685_p3) target bundleno = 567 (0x237), region = 60 }
  0xa9   : > { %v487_v22 = vld [vmem:[%s1032_s15] sm:$0xff]  ;;  %vm505_vm2 = vcmask 1040384   ;;  %v498_v7 = vld [vmem:[#allocation5 + $0x10] sm:$0xff]  ;;  %v921_v24 = vmov 0   ;;  %v497_v25 = vld [vmem:[#allocation5 + $0x8] sm:$0xff]  ;;  %v488_v27 = vlaneseq  ;;  %vm501_vm3 = vcmask 203776  }
  0xaa   : > { %v499_v23 = vld [vmem:[#allocation5 + $0x18] sm:$0x1]  ;;  %775 = vset.pattern.permute.xlu0 %v921_v24  ;;  %776 = vset.pattern.permute.xlu1 %v921_v24  ;;  %v496_v26 = vld [vmem:[#allocation5] sm:$0xff]  ;;  %v922_v30 = vmov 0.0   ;;  %vm561_vm5 = vcmp.ne.s32.totalorder %v487_v22, 0 }
  0xab   : > { %687 = vmatpush.msk.msra.mxu0 %vm505_vm2, %v499_v23  ;;  %491 = vperm.xlu0 %775, %v487_v22   ;;  %v489_v28 = vand.u32 127, %v488_v27  ;;  %v500_v32 = vld [vmem:[#allocation2] sm:$0xff]  ;;  %v689_v37 = vsel %vm561_vm5, 1.0, %v922_v30 }
  0xac   : > { %v777_v50 = vld [vmem:[%s1143_s5] ss:$0 sm:$0xff] }
  0xad   : > { %522 = vmatpush.msra.mxu0 %v498_v7  ;;  %v778_v53 = vld [vmem:[%s1144_s6] ss:$0 sm:$0xff] }
  0xaf   : > { %523 = vmatpush.msra.mxu0 %v497_v25 }
  0xb1   : > { %524 = vmatpush.msra.mxu0 %v496_v26 }
 0x11d   : > { %v492_v29 = vpop.permute.xlu0 %491 }
 0x11e   : > { %vm493_vm4 = vcmp.eq.s32.totalorder %v492_v29, %v489_v28 }
 0x11f   : > { %v686_v31 = vsel %vm493_vm4, 1.0, %v922_v30 }
 0x120   : > { %688 = vmatmul.msk.f32.vlgmr.msra.gmra.mxu0 %vm501_vm3, %v686_v31 }
 0x19d   : > { %v526_v33 = vpop.f32.mrf.mxu0 }
 0x19e   : > { %v527_v34 = vadd.f32 %v526_v33, %v500_v32 }
 0x1a0   : > { %529 = vadd.xlane.f32.xlu0 %v527_v34  ;;  %v531_v36 = vmul.f32 %v527_v34, %v527_v34 }
 0x1a2   : > { %532 = vadd.xlane.f32.xlu1 %v531_v36 }
 0x1bb   : > { %566 = vperm.xlu1 %776, %v689_v37  }
 0x213   : > { %v530_v38 = vpop.xlane.xlu0 %529 }
 0x214   : > { %v534_v39 = vmul.f32 0.03125, %v530_v38 }
 0x215   : > { %v533_v40 = vpop.xlane.xlu1 %532 }
 0x216   : > { %v536_v41 = vmul.f32 %v534_v39, %v534_v39  ;;  %v535_v42 = vmul.f32 0.03125, %v533_v40  ;;  %v538_v49 = vsub.f32 %v527_v34, %v534_v39 }
 0x218   : > { %v537_v43 = vsub.f32 %v535_v42, %v536_v41 }
 0x21a   : > { %v539_v17 = vadd.f32 1e-05, %v537_v43 }
 0x21c   : > { %779 = vrsqrt.f32 %v539_v17  ;;  %vm546_vm7 = vweird.f32 %v539_v17 }
 0x222   : > { %v780_v44 = vpop.eup %779 }
 0x223   : > { %v541_v45 = vmul.f32 %v780_v44, %v539_v17  ;;  %vm547_vm6 = vweird.f32 %v780_v44 }
 0x224   : > { %vm548_vm8 = vmor %vm546_vm7, %vm547_vm6 }
 0x225   : > { %v542_v46 = vmul.f32 %v780_v44, %v541_v45 }
 0x227   : > { %v543_v47 = vmul.f32 0.5, %v542_v46 }
 0x229   : > { %v544_v35 = vsub.f32 1.5, %v543_v47 }
 0x22b   : > { %v545_v48 = vmul.f32 %v780_v44, %v544_v35 }
 0x22d   : > { %v549_v51 = vsel %vm548_vm8, %v780_v44, %v545_v48  ;;  %v567_v55 = vpop.permute.xlu1 %566 }
 0x22e   : > { %v550_v52 = vmul.f32 %v549_v51, %v538_v49 }
 0x230   : > { %v555_v54 = vmul.f32 %v777_v50, %v550_v52 }
 0x232   : > { %v560_v56 = vadd.f32 %v778_v53, %v555_v54 }
 0x234   : > { %v569_v57 = vmul.f32 %v567_v55, %v560_v56 }
 0x236   : > { %570 = vst [vmem:[%s1034_s18] sm:$0xff] %v569_v57 }
 0x237 PF: > { %s691_s11 = sshll.u32 %s899_s8, 3  ;;  %s585_s20 = sshll.u32 %s1034_s18, 4  ;;  %s586_s20 = int_to_ptr.vmem [resolvable:$true] %s585_s20 }
 0x238   : > { %s583_s19 = scalar_lea.hbm %s1145_s7, %s691_s11  ;;  %s572_s22 = scalar_lea.sflag [#allocation7], %s288_s25 }
 0x239   : > { %s587_s21 = sshll.u32 %s583_s19, 4  ;;  %s843_s8 = scalar_lea.hbm %s1145_s7, 16  ;;  %s588_s21 = int_to_ptr.hbm [resolvable:$true] %s587_s21 }
 0x23a   : > { %s837_s23 = sshra.s32 %s588_s21, 4  ;;  %s838_s23 = int_to_ptr.hbm [resolvable:$true] %s837_s23 }
 0x23b   : > { %s839_s24 = scalar_lea.hbm %s838_s23, 8  ;;  %p844_p9 = scmp.lt.s32.totalorder %s838_s23, %s1145_s7 }
 0x23c   : > { %p840_p5 = scmp.ne.s32.totalorder %s838_s23, %s839_s24  ;;  %p845_p10 = scmp.lt.s32.totalorder %s843_s8, %s839_s24 }
 0x23e   : > { %p841_p6 = pnand %p840_p5, %p1006_p4  ;;  %p846_p11 = por %p845_p10, %p844_p9 }
 0x240   : > { %p842_p7 = pneg %p841_p6 }
 0x242   : > { %p847_p12 = pnand %p846_p11, %p842_p7 }
 0x244   : > { %850 = shalt.err (!%p847_p12)
}
 0x245   : > { %698 = dma.vmem_to_hbm [thread:$0]  (%p1006_p4), %s586_s20, 128, %s588_s21, %s572_s22  }
 0x246 PF: > { %p710_p13 = scmp.ge.s32.totalorder %s907_s0, 2  ;;  %s599_s25 = sand.u32 1, %s887_s28  }
 0x247   : > { %s600_s18 = scalar_lea.sflag [#allocation7], %s599_s25 }
 0x248   : > { %p705_p0 = pnand %p710_p13, %p1013_p8 }
 0x24a   : > { %p706_p1 = pneg %p705_p0 }
 0x24c   : > { %882 = dma.done.wait (%p706_p1), %s600_s18, 128  }
 0x24d   : > { %884 = vsyncadd (%p706_p1), %s600_s18, 4294967168  ;;  %s29_s0 = sadd.s32 1, %s907_s0   ;;  %s1148_s28 = smov %s891_s29 }
 0x24e   : > { %p26_p2 = scmp.ge.s32.totalorder %s29_s0, 4   ;;  %s1149_s29 = smov %s895_s30 }
 0x24f   : > { %s1150_s30 = smov %s1019_s17  ;;  %s1151_s8 = smov %s903_s9 }
 0x250   : > { %s1152_s9 = smov %s1154_s12  ;;  %28 = sbr.rel (!%p26_p2) target bundleno = 11 (0xb), region = 96 }
 0x255   :  { %606 = vsyncpa [#allocation6], 1 }
 0x256   :  { %608 = vsyncpa [#allocation6 + $0x1], 1 }
 0x257   :  { %609 = vsyncpa [#allocation7], 1 }
 0x258   :  { %611 = vsyncpa [#allocation7 + $0x1], 1 }

</bundles_post_ra>
